<compile_context>
chip_gen: v7x
topology: tpu7x:2x2x1
jax: 0.10.0
libtpu: 0.0.40
codegen_flags: <defaults>
</compile_context>

<pallas_src>
import jax
import jax.numpy as jnp
from jax.experimental import pallas as pl
from jax.experimental.pallas import tpu as pltpu

DEPTH = 128                                        # self.depth in the PyTorch module
NEG_MASK = float(jnp.finfo(jnp.float32).min)       # == -finfo(float32).max


# --------------------------------------------------------------------------- #
# Tile sizing / VMEM budgeting
# --------------------------------------------------------------------------- #
def _vmem_capacity_bytes():
    try:
        return int(pltpu.get_tpu_info().vmem_capacity_bytes)
    except Exception:
        return 64 << 20        # conservative fallback: v7x per-TensorCore VMEM


def _step_vmem_bytes(bt, S, F, C_pad, masked):
    """Approximate per-grid-step VMEM use (double-buffered I/O + intermediates)."""
    d = DEPTH
    x_in = 2 * bt * S * F * 2                        # bf16 x, double-buffered
    m_in = (2 * bt * S * S) if masked else 0         # int8 mask, double-buffered
    wgt = 2 * (F * 3 * d * 2 + 3 * d * 4 + d * C_pad * 2 + C_pad * 4)
    out = 2 * bt * C_pad * 4
    inter = (bt * S * 3 * d * 4                      # qkv (f32)
             + 2 * bt * S * S * 4                    # logits + probs (f32)
             + bt * S * d * 4                        # ctx (f32)
             + bt * C_pad * 4)                       # final out (f32)
    return x_in + m_in + wgt + out + inter


def _pick_batch_tile(B, S, F, C_pad, masked, budget):
    # Target ~2048 rows in the fused (Bt*S, F) projection matmul, then shrink
    # until the per-step footprint fits the VMEM budget.
    bt = max(1, min(B, 2048 // max(S, 1)))
    while bt > 1 and _step_vmem_bytes(bt, S, F, C_pad, masked) > budget:
        bt = (bt + 1) // 2
    # v7x has 2 TensorCores: make sure the (parallel) batch grid has >= 2 steps.
    if B > 1:
        bt = min(bt, (B + 1) // 2)
    # Prefer a divisor of B so the wrapper never has to materialize a padded x.
    dvs = bt
    while dvs > 1 and B % dvs != 0:
        dvs -= 1
    if dvs * 2 >= bt or dvs >= 8:
        bt = dvs
    return max(1, bt)


# --------------------------------------------------------------------------- #
# Kernel
# --------------------------------------------------------------------------- #
def _attention_core(x_ref, wqkv_ref, bqkv_ref, wl_ref, bl_ref, out_ref, mask_ref):
    bt, s, f = x_ref.shape

    # Fused Q/K/V projection: one tall bf16 MXU matmul, f32 accumulation.
    x2 = x_ref[...].reshape(bt * s, f)                               # bf16
    qkv = jnp.dot(x2, wqkv_ref[...], preferred_element_type=jnp.float32)
    qkv = qkv + bqkv_ref[...]                                        # f32
    qkv = qkv.reshape(bt, s, 3 * DEPTH)
    q = qkv[:, :, :DEPTH].astype(jnp.bfloat16)      # 1/sqrt(depth) folded into Wq/bq
    k = qkv[:, :, DEPTH:2 * DEPTH].astype(jnp.bfloat16)
    v = qkv[:, :, 2 * DEPTH:].astype(jnp.bfloat16)

    # logits: contract on the last dim of both operands (no explicit transpose).
    logit = jnp.einsum("bsd,btd->bst", q, k, preferred_element_type=jnp.float32)

    if mask_ref is not None:
        # Single select; identical to the torch additive mask after softmax.
        logit = jnp.where(mask_ref[...] != 0, NEG_MASK, logit)

    # softmax over the last axis.
    m = jnp.max(logit, axis=-1, keepdims=True)
    p = jnp.exp(logit - m)
    denom = jnp.sum(p, axis=-1, keepdims=True)
    attn_w = (p * pl.reciprocal(denom, approx=True)).astype(jnp.bfloat16)

    # attention_output = attn_w @ v  -> (Bt, S, DEPTH), f32 accumulation.
    ctx = jnp.einsum("bst,btd->bsd", attn_w, v, preferred_element_type=jnp.float32)

    # mean over the sequence commutes with the affine last_linear, so reduce
    # first and run the final matmul on Bt rows instead of Bt*S.
    ctx_mean = jnp.mean(ctx, axis=1).astype(jnp.bfloat16)            # (Bt, DEPTH)
    out = jnp.dot(ctx_mean, wl_ref[...], preferred_element_type=jnp.float32)
    out = out + bl_ref[...]                                          # (Bt, C_pad)
    out_ref[...] = out[None].astype(out_ref.dtype)                   # (1, Bt, C_pad)


def _kernel_nomask(x_ref, wqkv_ref, bqkv_ref, wl_ref, bl_ref, out_ref):
    _attention_core(x_ref, wqkv_ref, bqkv_ref, wl_ref, bl_ref, out_ref, None)


def _kernel_masked(x_ref, mask_ref, wqkv_ref, bqkv_ref, wl_ref, bl_ref, out_ref):
    _attention_core(x_ref, wqkv_ref, bqkv_ref, wl_ref, bl_ref, out_ref, mask_ref)


# --------------------------------------------------------------------------- #
# Wrapper
# --------------------------------------------------------------------------- #
def simple_attention_net(x, params, attention_mask=None, is_scaled_dot_product=True):
    """x: (B, S, F) float32. attention_mask: optional (B, S, S) bool, True = masked."""
    B, S, F = x.shape
    wq, bq, wk, bk, wv, bv, wl, bl = params
    C = wl.shape[1]
    masked = attention_mask is not None

    # Fold the softmax scale into the query projection (wrapper-side constants),
    # fuse Q/K/V weights, and cast matmul operands to bf16.
    scale = (1.0 / (DEPTH ** 0.5)) if is_scaled_dot_product else 1.0
    wqkv = jnp.concatenate([wq * scale, wk, wv], axis=1).astype(jnp.bfloat16)
    bqkv = jnp.concatenate([bq * scale, bk, bv], axis=0).reshape(1, 3 * DEPTH)
    bqkv = bqkv.astype(jnp.float32)

    # Lane-dense output: pad num_classes up to a multiple of 128.
    C_pad = ((C + 127) // 128) * 128
    wl_p = jnp.pad(wl, ((0, 0), (0, C_pad - C))).astype(jnp.bfloat16)
    bl_p = jnp.pad(bl, ((0, C_pad - C),)).reshape(1, C_pad).astype(jnp.float32)

    # Generation-aware VMEM budget and batch tile.
    cap = _vmem_capacity_bytes()
    bt = _pick_batch_tile(B, S, F, C_pad, masked, budget=cap // 2)
    nb = pl.cdiv(B, bt)
    B_pad = nb * bt

    x_bf = x.astype(jnp.bfloat16)
    if B_pad != B:   # only when no good divisor of B exists
        x_bf = jnp.pad(x_bf, ((0, B_pad - B), (0, 0), (0, 0)))
        if masked:
            attention_mask = jnp.pad(attention_mask,
                                     ((0, B_pad - B), (0, 0), (0, 0)))

    need = _step_vmem_bytes(bt, S, F, C_pad, masked)
    vmem_limit = int(min(cap * 3 // 4, max(need + (8 << 20), 32 << 20)))
    cparams = pltpu.CompilerParams(dimension_semantics=("parallel",),
                                   vmem_limit_bytes=vmem_limit)

    cost = pl.CostEstimate(
        flops=int(2 * B_pad * S * F * 3 * DEPTH          # fused projection
                  + 4 * B_pad * S * S * DEPTH            # QK^T + PV
                  + 2 * B_pad * DEPTH * C_pad),          # last linear
        transcendentals=int(B_pad * S * S),
        bytes_accessed=int(B_pad * S * F * 2
                           + (B_pad * S * S if masked else 0)
                           + F * 3 * DEPTH * 2 + 3 * DEPTH * 4
                           + DEPTH * C_pad * 2 + C_pad * 4
                           + B_pad * C_pad * 4),
    )

    full2 = lambda b: (0, 0)
    x_spec = pl.BlockSpec((bt, S, F), lambda b: (b, 0, 0))
    w_specs = [
        pl.BlockSpec((F, 3 * DEPTH), full2),     # fused Wqkv (bf16, VMEM-resident)
        pl.BlockSpec((1, 3 * DEPTH), full2),     # fused bqkv (f32)
        pl.BlockSpec((DEPTH, C_pad), full2),     # W_last (bf16, padded)
        pl.BlockSpec((1, C_pad), full2),         # b_last (f32, padded)
    ]
    # Output lives as (nb, bt, C_pad): the block's last two dims always equal
    # the full array dims (legal for any bt) and stores are sublane/lane-dense.
    out_spec = pl.BlockSpec((1, bt, C_pad), lambda b: (b, 0, 0))
    out_shape = jax.ShapeDtypeStruct((nb, bt, C_pad), jnp.float32)

    if not masked:
        out = pl.pallas_call(
            _kernel_nomask,
            out_shape=out_shape,
            grid_spec=pl.GridSpec(grid=(nb,), in_specs=[x_spec] + w_specs,
                                  out_specs=out_spec),
            compiler_params=cparams,
            cost_estimate=cost,
        )(x_bf, wqkv, bqkv, wl_p, bl_p)
    else:
        mask_i8 = attention_mask.astype(jnp.int8)
        mask_spec = pl.BlockSpec((bt, S, S), lambda b: (b, 0, 0))
        out = pl.pallas_call(
            _kernel_masked,
            out_shape=out_shape,
            grid_spec=pl.GridSpec(grid=(nb,), in_specs=[x_spec, mask_spec] + w_specs,
                                  out_specs=out_spec),
            compiler_params=cparams,
            cost_estimate=cost,
        )(x_bf, mask_i8, wqkv, bqkv, wl_p, bl_p)

    return out.reshape(B_pad, C_pad)[:B, :C]


# --------------------------------------------------------------------------- #
# Params / reference / demo
# --------------------------------------------------------------------------- #
def init_params(key, feature_dim, num_classes):
    """Deterministic synthetic parameters (Linear weights stored as (in, out))."""
    ks = jax.random.split(key, 8)
    scale = 0.02
    wq = scale * jax.random.normal(ks[0], (feature_dim, DEPTH), jnp.float32)
    bq = scale * jax.random.normal(ks[1], (DEPTH,), jnp.float32)
    wk = scale * jax.random.normal(ks[2], (feature_dim, DEPTH), jnp.float32)
    bk = scale * jax.random.normal(ks[3], (DEPTH,), jnp.float32)
    wv = scale * jax.random.normal(ks[4], (feature_dim, DEPTH), jnp.float32)
    bv = scale * jax.random.normal(ks[5], (DEPTH,), jnp.float32)
    wl = scale * jax.random.normal(ks[6], (DEPTH, num_classes), jnp.float32)
    bl = scale * jax.random.normal(ks[7], (num_classes,), jnp.float32)
    return (wq, bq, wk, bk, wv, bv, wl, bl)


def _reference(x, params, attention_mask, is_scaled):
    """Plain-JAX f32 reference mirroring the PyTorch forward."""
    wq, bq, wk, bk, wv, bv, wl, bl = params
    q = x @ wq + bq
    k = x @ wk + bk
    v = x @ wv + bv
    if is_scaled:
        q = q / (DEPTH ** 0.5)
    logit = jnp.einsum("bsd,btd->bst", q, k)
    if attention_mask is not None:
        logit = logit + jnp.where(attention_mask, NEG_MASK, 0.0)
    w = jax.nn.softmax(logit, axis=2)
    attn = jnp.einsum("bst,btd->bsd", w, v)
    out = attn @ wl + bl
    return out.mean(axis=1)


if __name__ == "__main__":
    # Small shapes implied by the forward: batch=2, seq=8, feature_dim=32, classes=10.
    B, S, F, C = 2, 8, 32, 10
    key = jax.random.PRNGKey(0)
    kx, kp, km = jax.random.split(key, 3)

    x = jax.random.normal(kx, (B, S, F), jnp.float32)
    params = init_params(kp, F, C)

    # mask=None path (no mask materialized, mask-free kernel variant).
    out = simple_attention_net(x, params, attention_mask=None,
                               is_scaled_dot_product=True)
    out = jax.block_until_ready(out)

    # boolean attention-mask path (mask applied inside the kernel as int8 select).
    mask = jax.random.bernoulli(km, 0.25, (B, S, S))
    out_m = simple_attention_net(x, params, attention_mask=mask,
                                 is_scaled_dot_product=True)
    out_m = jax.block_until_ready(out_m)

    ref = _reference(x, params, None, True)
    ref_m = _reference(x, params, mask, True)
    assert out.shape == (B, C) and out_m.shape == (B, C)
    # Tolerance covers bf16 matmul operands, approx reciprocal, reassociated mean.
    assert jnp.allclose(out, ref, atol=5e-3, rtol=5e-3)
    assert jnp.allclose(out_m, ref_m, atol=5e-3, rtol=5e-3)

    print("KERNEL_OK")
</pallas_src>

<mosaic_0001>
module attributes {stable_mosaic.version = 11 : i64} {
  func.func @_kernel_nomask(%arg0: i32, %arg1: memref<1x8x32xbf16, #tpu.memory_space<vmem>>, %arg2: memref<32x384xbf16, #tpu.memory_space<vmem>>, %arg3: memref<1x384xf32, #tpu.memory_space<vmem>>, %arg4: memref<128x128xbf16, #tpu.memory_space<vmem>>, %arg5: memref<1x128xf32, #tpu.memory_space<vmem>>, %arg6: memref<1x1x128xf32, #tpu.memory_space<vmem>>) attributes {dimension_semantics = [#tpu.dimension_semantics<parallel>], iteration_bounds = array<i64: 2>, scalar_prefetch = 0 : i64, scratch_operands = 0 : i64, tpu.core_type = #tpu.core_type<tc>, window_params = [{transform_indices = @transform_0, window_bounds = array<i64: 1, 8, 32>}, {pipeline_mode = #tpu.pipeline_mode<synchronous>, transform_indices = @transform_1, window_bounds = array<i64: 32, 384>}, {pipeline_mode = #tpu.pipeline_mode<synchronous>, transform_indices = @transform_2, window_bounds = array<i64: 1, 384>}, {pipeline_mode = #tpu.pipeline_mode<synchronous>, transform_indices = @transform_3, window_bounds = array<i64: 128, 128>}, {pipeline_mode = #tpu.pipeline_mode<synchronous>, transform_indices = @transform_4, window_bounds = array<i64: 1, 128>}, {transform_indices = @transform_5, window_bounds = array<i64: 1, 1, 128>}]} {
    %c0 = arith.constant 0 : index
    %c0_0 = arith.constant 0 : index
    %c0_1 = arith.constant 0 : index
    %0 = vector.load %arg1[%c0, %c0_0, %c0_1] : memref<1x8x32xbf16, #tpu.memory_space<vmem>>, vector<1x8x32xbf16>
    %1 = vector.shape_cast %0 : vector<1x8x32xbf16> to vector<8x32xbf16>
    %c0_2 = arith.constant 0 : index
    %c0_3 = arith.constant 0 : index
    %2 = vector.load %arg2[%c0_2, %c0_3] : memref<32x384xbf16, #tpu.memory_space<vmem>>, vector<32x384xbf16>
    %cst = arith.constant dense<0.000000e+00> : vector<8x384xf32>
    %3 = tpu.matmul %1, %2, %cst {dimension_numbers = #tpu.dot_dimension_numbers<[1], [0], [0], [1], [0, 0, 1, 1], [], []>} : vector<8x32xbf16>, vector<32x384xbf16>, vector<8x384xf32> -> vector<8x384xf32>
    %c0_4 = arith.constant 0 : index
    %c0_5 = arith.constant 0 : index
    %4 = vector.load %arg3[%c0_4, %c0_5] : memref<1x384xf32, #tpu.memory_space<vmem>>, vector<1x384xf32>
    %5 = vector.broadcast %4 : vector<1x384xf32> to vector<8x384xf32>
    %6 = arith.addf %3, %5 : vector<8x384xf32>
    %7 = vector.shape_cast %6 : vector<8x384xf32> to vector<1x8x384xf32>
    %8 = vector.extract_strided_slice %7 {offsets = [0, 0, 0], sizes = [1, 8, 128], strides = [1, 1, 1]} : vector<1x8x384xf32> to vector<1x8x128xf32>
    %9 = arith.truncf %8 : vector<1x8x128xf32> to vector<1x8x128xbf16>
    %10 = vector.extract_strided_slice %7 {offsets = [0, 0, 128], sizes = [1, 8, 128], strides = [1, 1, 1]} : vector<1x8x384xf32> to vector<1x8x128xf32>
    %11 = arith.truncf %10 : vector<1x8x128xf32> to vector<1x8x128xbf16>
    %12 = vector.extract_strided_slice %7 {offsets = [0, 0, 256], sizes = [1, 8, 128], strides = [1, 1, 1]} : vector<1x8x384xf32> to vector<1x8x128xf32>
    %13 = arith.truncf %12 : vector<1x8x128xf32> to vector<1x8x128xbf16>
    "tpu.trace_start"() <{level = 10 : i32, message = "bsd,btd->bst"}> : () -> ()
    %cst_6 = arith.constant dense<0.000000e+00> : vector<1x8x8xf32>
    %14 = tpu.matmul %9, %11, %cst_6 {dimension_numbers = #tpu.dot_dimension_numbers<[2], [2], [1], [1], [0, 0, 0, 1, 1, 1], [0], [0]>} : vector<1x8x128xbf16>, vector<1x8x128xbf16>, vector<1x8x8xf32> -> vector<1x8x8xf32>
    "tpu.trace_stop"() : () -> ()
    %cst_7 = arith.constant dense<0xFF800000> : vector<1x8xf32>
    %15 = vector.multi_reduction <maximumf>, %14, %cst_7 [2] : vector<1x8x8xf32> to vector<1x8xf32>
    %16 = vector.shape_cast %15 : vector<1x8xf32> to vector<1x8x1xf32>
    %17 = vector.broadcast %16 : vector<1x8x1xf32> to vector<1x8x8xf32>
    %18 = arith.subf %14, %17 : vector<1x8x8xf32>
    %19 = math.exp %18 : vector<1x8x8xf32>
    %cst_8 = arith.constant dense<0.000000e+00> : vector<1x8xf32>
    %20 = vector.multi_reduction <add>, %19, %cst_8 [2] : vector<1x8x8xf32> to vector<1x8xf32>
    %21 = vector.shape_cast %20 : vector<1x8xf32> to vector<1x8x1xf32>
    %22 = tpu.reciprocal %21 {approx = true} : vector<1x8x1xf32> -> vector<1x8x1xf32>
    %23 = vector.broadcast %22 : vector<1x8x1xf32> to vector<1x8x8xf32>
    %24 = arith.mulf %19, %23 : vector<1x8x8xf32>
    %25 = arith.truncf %24 : vector<1x8x8xf32> to vector<1x8x8xbf16>
    "tpu.trace_start"() <{level = 10 : i32, message = "bst,btd->bsd"}> : () -> ()
    %cst_9 = arith.constant dense<0.000000e+00> : vector<1x8x128xf32>
    %26 = tpu.matmul %25, %13, %cst_9 {dimension_numbers = #tpu.dot_dimension_numbers<[2], [1], [1], [2], [0, 0, 0, 1, 1, 2], [0], [0]>} : vector<1x8x8xbf16>, vector<1x8x128xbf16>, vector<1x8x128xf32> -> vector<1x8x128xf32>
    "tpu.trace_stop"() : () -> ()
    %cst_10 = arith.constant dense<0.000000e+00> : vector<1x128xf32>
    %27 = vector.multi_reduction <add>, %26, %cst_10 [1] : vector<1x8x128xf32> to vector<1x128xf32>
    %cst_11 = arith.constant 8.000000e+00 : f32
    %28 = vector.broadcast %cst_11 : f32 to vector<1x128xf32>
    %29 = arith.divf %27, %28 : vector<1x128xf32>
    %30 = arith.truncf %29 : vector<1x128xf32> to vector<1x128xbf16>
    %c0_12 = arith.constant 0 : index
    %c0_13 = arith.constant 0 : index
    %31 = vector.load %arg4[%c0_12, %c0_13] : memref<128x128xbf16, #tpu.memory_space<vmem>>, vector<128x128xbf16>
    %cst_14 = arith.constant dense<0.000000e+00> : vector<1x128xf32>
    %32 = tpu.matmul %30, %31, %cst_14 {dimension_numbers = #tpu.dot_dimension_numbers<[1], [0], [0], [1], [0, 0, 1, 1], [], []>} : vector<1x128xbf16>, vector<128x128xbf16>, vector<1x128xf32> -> vector<1x128xf32>
    %c0_15 = arith.constant 0 : index
    %c0_16 = arith.constant 0 : index
    %33 = vector.load %arg5[%c0_15, %c0_16] : memref<1x128xf32, #tpu.memory_space<vmem>>, vector<1x128xf32>
    %34 = arith.addf %32, %33 : vector<1x128xf32>
    %35 = vector.shape_cast %34 : vector<1x128xf32> to vector<1x1x128xf32>
    %c0_17 = arith.constant 0 : index
    %c0_18 = arith.constant 0 : index
    %c0_19 = arith.constant 0 : index
    %36 = vector.load %arg6[%c0_17, %c0_18, %c0_19] : memref<1x1x128xf32, #tpu.memory_space<vmem>>, vector<1x1x128xf32>
    tpu.vector_store %arg6[%c0_17, %c0_18, %c0_19], %35 {strides = array<i32>} : memref<1x1x128xf32, #tpu.memory_space<vmem>>, vector<1x1x128xf32>,
    return
  }
  func.func @transform_0(%arg0: i32) -> (i32, i32, i32) {
    %c0_i32 = arith.constant 0 : i32
    %c0_i32_0 = arith.constant 0 : i32
    %c0_i32_1 = arith.constant 0 : i32
    return %arg0, %c0_i32, %c0_i32_0 : i32, i32, i32
  }
  func.func @transform_1(%arg0: i32) -> (i32, i32) {
    %c0_i32 = arith.constant 0 : i32
    %c0_i32_0 = arith.constant 0 : i32
    %c0_i32_1 = arith.constant 0 : i32
    return %c0_i32, %c0_i32_0 : i32, i32
  }
  func.func @transform_2(%arg0: i32) -> (i32, i32) {
    %c0_i32 = arith.constant 0 : i32
    %c0_i32_0 = arith.constant 0 : i32
    %c0_i32_1 = arith.constant 0 : i32
    return %c0_i32, %c0_i32_0 : i32, i32
  }
  func.func @transform_3(%arg0: i32) -> (i32, i32) {
    %c0_i32 = arith.constant 0 : i32
    %c0_i32_0 = arith.constant 0 : i32
    %c0_i32_1 = arith.constant 0 : i32
    return %c0_i32, %c0_i32_0 : i32, i32
  }
  func.func @transform_4(%arg0: i32) -> (i32, i32) {
    %c0_i32 = arith.constant 0 : i32
    %c0_i32_0 = arith.constant 0 : i32
    %c0_i32_1 = arith.constant 0 : i32
    return %c0_i32, %c0_i32_0 : i32, i32
  }
  func.func @transform_5(%arg0: i32) -> (i32, i32, i32) {
    %c0_i32 = arith.constant 0 : i32
    %c0_i32_0 = arith.constant 0 : i32
    %c0_i32_1 = arith.constant 0 : i32
    return %arg0, %c0_i32, %c0_i32_0 : i32, i32, i32
  }
}

</mosaic_0001>

<bundles_post_ra>
// kernel: tpu_custom_call.1
= control target key start
LH: loop header
LB: loop body
LE: loop exit
PB: predicated region body
PF: predicated region fallthrough
CT: control target
= control target key end

     0   :  { %10 = vsyncpa [#allocation3], 0  ;;  %s1367_s0 = inlined_call_operand.hbm [shape: bf16[2,8,32], index: 0, kind: input, shape index: {}]   ;;  %s1368_s1 = inlined_call_operand.hbm [shape: bf16[32,384], index: 1, kind: input, shape index: {}]   ;;  %s1369_s2 = inlined_call_operand.vmem [shape: f32[1,384], index: 2, kind: input, shape index: {}]   ;;  %s1370_s3 = inlined_call_operand.hbm [shape: bf16[128,128], index: 3, kind: input, shape index: {}]   ;;  %s1371_s4 = inlined_call_operand.vmem [shape: f32[1,128], index: 4, kind: input, shape index: {}]   ;;  %s1372_s5 = inlined_call_operand.hbm [shape: f32[2,1,128], index: 5, kind: output, shape index: {}]  }
   0x1   :  { %12 = vsyncpa [#allocation3 + $0x1], 0 }
   0x2   :  { %13 = vsyncpa [#allocation6], 0 }
   0x3   :  { %14 = vsyncpa [#allocation4], 0 }
   0x4   :  { %16 = vsyncpa [#allocation4 + $0x1], 0  ;;  %s1108_s18 = smov 0   ;;  %s1110_s19 = smov 0  }
   0x5   :  { %s1112_s20 = smov 0   ;;  %s1114_s21 = smov 0  }
   0x6 LB: > { %s1129_s22 = sadd.s32 4294967295, %s1065_s21   ;;  %s728_s23 = sadd.s32 4294967294, %s1065_s21   ;;  %s1065_s21 = sphi %s1114_s21, %s1392_s21   ;;  %s1061_s20 = sphi %s1112_s20, %s1391_s20   ;;  %s1057_s19 = sphi %s1110_s19, %s1390_s19   ;;  %s1053_s18 = sphi %s1108_s18, %s1389_s18  }
   0x7   : > { %p42_p0 = scmp.ne.s32.totalorder %s1057_s19, %s1053_s18  ;;  %p1373_p1 = scmp.eq.s32.totalorder %s1129_s22, 0 }
   0x8   : > { %p156_p3 = scmp.eq.s32.totalorder %s728_s23, 1  ;;  %p729_p5 = scmp.ge.s32.totalorder %s1065_s21, 1 }
   0x9   : > { %p1138_p4 = por %p1373_p1, %p42_p0  ;;  %p163_p7 = scmp.lt.s32.totalorder %s1065_s21, 3 }
   0xa   : > { %p1143_p6 = por %p156_p3, %p42_p0  ;;  %s1067_s27 = smov [#allocation5]  }
   0xb   : > { %s1376_s24 = scalar_select %p1138_p4, 1, 0 }
   0xc   : > { %s1377_s25 = scalar_select %p1143_p6, 1, 0 }
   0xd   : > { %p1148_p8 = pnand %p729_p5, %p163_p7  ;;  %s175_s28 = sshll.u32 %s1067_s27, 4  ;;  %s1152_s28 = int_to_ptr.vmem [resolvable:$true] %s175_s28 }
   0xe   : > { %s1068_s30 = smov [#allocation7]   ;;  %s909_s9 = scalar_lea.hbm %s1368_s1, 768 }
   0xf   : > { %p827_p9 = pneg %p1148_p8  ;;  %s191_s6 = sshll.u32 %s1068_s30, 4  ;;  %s1163_s6 = int_to_ptr.vmem [resolvable:$true] %s191_s6 }
  0x10   : > { %p910_p12 = scmp.ne.s32.totalorder %s1368_s1, %s909_s9  ;;  %p916_p5 = scmp.lt.u32.totalorder %s909_s9, %s1368_s1 }
  0x11   : > { %p1159_p11 = pnand %p827_p9, %p1373_p1 }
  0x13   : > { %p911_p13 = pneg %p1159_p11 }
  0x15   : > { %p912_p0 = pnand %p911_p13, %p910_p12 }
  0x17   : > { %p913_p3 = pneg %p912_p0 }
  0x19   : > { %p918_p7 = pnand %p916_p5, %p913_p3 }
  0x1b   : > { %921 = shalt.err (!%p918_p7)
}
  0x1c   : > { %s922_s14 = scalar_lea.vmem %s1152_s28, 768  ;;  %p930_p2 = scmp.lt.s32.totalorder %s1152_s28, %s1152_s28 }
  0x1d   : > { %p923_p9 = scmp.ne.s32.totalorder %s1152_s28, %s922_s14  ;;  %p931_p12 = scmp.lt.s32.totalorder %s922_s14, %s922_s14 }
  0x1f   : > { %p925_p10 = pnand %p923_p9, %p911_p13  ;;  %p932_p0 = por %p931_p12, %p930_p2 }
  0x21   : > { %p926_p1 = pneg %p925_p10 }
  0x23   : > { %p933_p6 = pnand %p932_p0, %p926_p1 }
  0x25   : > { %936 = shalt.err (!%p933_p6)
}
  0x26   : > { %s1069_s15 = smov 192   ;;  %s1070_s16 = smov 12  }
  0x27   : > { %830 = dma.hbm_to_vmem [thread:$0]  (!%p1159_p11), %s1368_s1, 768, %s1152_s28, [#allocation6], %s1069_s15, %s1069_s15, %s1070_s16  }
  0x28   : > { %s937_s7 = scalar_lea.hbm %s1370_s3, 1024 }
  0x29   : > { %p938_p2 = scmp.ne.s32.totalorder %s1370_s3, %s937_s7  ;;  %p944_p10 = scmp.lt.u32.totalorder %s937_s7, %s1370_s3 }
  0x2b   : > { %p940_p1 = pnand %p938_p2, %p911_p13 }
  0x2d   : > { %p941_p6 = pneg %p940_p1 }
  0x2f   : > { %p946_p3 = pnand %p944_p10, %p941_p6 }
  0x31   : > { %949 = shalt.err (!%p946_p3)
}
  0x32   : > { %s950_s28 = scalar_lea.vmem %s1163_s6, 1024  ;;  %p958_p12 = scmp.lt.s32.totalorder %s1163_s6, %s1163_s6 }
  0x33   : > { %p951_p5 = scmp.ne.s32.totalorder %s1163_s6, %s950_s28  ;;  %p959_p0 = scmp.lt.s32.totalorder %s950_s28, %s950_s28 }
  0x35   : > { %p953_p7 = pnand %p951_p5, %p911_p13  ;;  %p960_p2 = por %p959_p0, %p958_p12 }
  0x37   : > { %p954_p9 = pneg %p953_p7 }
  0x39   : > { %p961_p1 = pnand %p960_p2, %p954_p9 }
  0x3b   : > { %964 = shalt.err (!%p961_p1)
}
  0x3c   : > { %s1071_s12 = smov 64   ;;  %s1072_s13 = smov 4  }
  0x3d   : > { %833 = dma.hbm_to_vmem [thread:$0]  (!%p1159_p11), %s1370_s3, 1024, %s1163_s6, [#allocation6], %s1071_s12, %s1071_s12, %s1072_s13  }
  0x3e   : > { %s1218_s16 = sadd.s32 1, %s1065_s21   ;;  %s29_s23 = sadd.s32 1, %s1061_s20 }
  0x3f   : > { %s26_s17 = ssub.s32 %s1065_s21, %s1218_s16  ;;  %p36_p6 = scmp.ne.s32.totalorder %s1061_s20, %s1057_s19 }
  0x40   : > { %p27_p13 = scmp.eq.s32.totalorder %s26_s17, 0  ;;  %p37_p10 = scmp.eq.s32.totalorder %s1065_s21, 0 }
  0x41   : > { %p1380_p5 = scmp.eq.s32.totalorder %s1129_s22, 1  ;;  %p844_p9 = scmp.lt.s32.totalorder %s1065_s21, 2 }
  0x42   : > { %s1227_s27 = scalar_select %p27_p13, %s1061_s20, %s29_s23  }
  0x43   : > { %p38_p3 = por %p37_p10, %p36_p6  ;;  %p1231_p7 = por %p1380_p5, %p36_p6 }
  0x44   : > { %s208_s29 = sand.u32 1, %s1061_s20   ;;  %s734_s6 = sshll.u32 %s1065_s21, 6 }
  0x45   : > { %s1381_s30 = scalar_select %p1231_p7, 1, 0 }
  0x46   : > { %s733_s7 = sshll.u32 %s208_s29, 2  ;;  %s1241_s10 = scalar_lea.hbm %s1367_s0, %s734_s6 }
  0x47   : > { %s212_s11 = scalar_lea.vmem [#allocation2], %s733_s7  ;;  %p1245_p11 = pnand %p844_p9, %p38_p3 }
  0x48   : > { %s219_s28 = sshll.u32 %s212_s11, 4  ;;  %s209_s13 = scalar_lea.sflag [#allocation3], %s208_s29  ;;  %s1243_s28 = int_to_ptr.vmem [resolvable:$true] %s219_s28 }
  0x49   : > { %s965_s14 = scalar_lea.hbm %s1241_s10, 64  ;;  %p967_p0 = pneg %p1245_p11 }
  0x4a   : > { %p966_p12 = scmp.ne.s32.totalorder %s1241_s10, %s965_s14  ;;  %s970_s23 = scalar_lea.hbm %s1367_s0, 128 }
  0x4b   : > { %p971_p13 = scmp.lt.u32.totalorder %s1241_s10, %s1367_s0  ;;  %p972_p6 = scmp.lt.u32.totalorder %s970_s23, %s965_s14 }
  0x4c   : > { %p968_p2 = pnand %p967_p0, %p966_p12  ;;  %p974_p3 = scmp.lt.u32.totalorder %s965_s14, %s1241_s10 }
  0x4d   : > { %p973_p10 = por %p972_p6, %p971_p13 }
  0x4e   : > { %p969_p1 = pneg %p968_p2 }
  0x4f   : > { %p975_p5 = por %p974_p3, %p973_p10 }
  0x51   : > { %p976_p9 = pnand %p975_p5, %p969_p1 }
  0x53   : > { %979 = shalt.err (!%p976_p9)
}
  0x54   : > { %s980_s29 = scalar_lea.vmem %s1243_s28, 64  ;;  %s1073_s8 = smov [#allocation2]  }
  0x55   : > { %p981_p12 = scmp.ne.s32.totalorder %s1243_s28, %s980_s29  ;;  %s985_s9 = sshll.u32 %s1073_s8, 4  ;;  %s986_s9 = int_to_ptr.vmem [resolvable:$false] %s985_s9 }
  0x56   : > { %s987_s11 = scalar_lea.vmem %s986_s9, 128  ;;  %p988_p4 = scmp.lt.s32.totalorder %s1243_s28, %s986_s9 }
  0x57   : > { %p983_p2 = pnand %p981_p12, %p967_p0  ;;  %p989_p13 = scmp.lt.s32.totalorder %s987_s11, %s980_s29 }
  0x59   : > { %p984_p7 = pneg %p983_p2  ;;  %p990_p6 = por %p989_p13, %p988_p4 }
  0x5b   : > { %p991_p10 = pnand %p990_p6, %p984_p7 }
  0x5d   : > { %994 = shalt.err (!%p991_p10)
}
  0x5e   : > { %837 = dma.hbm_to_vmem [thread:$0]  (!%p1245_p11), %s1241_s10, 64, %s1243_s28, %s209_s13  }
  0x5f   : > { %228 = sbr.rel (%p1148_p8) target bundleno = 1324 (0x52c), region = 40  ;;  %s1277_s14 = sand.u32 (!%p1148_p8), 1, %s1057_s19  }
  0x60   : > { %s736_s15 = sshll.u32 (!%p1148_p8), %s1277_s14, 2  ;;  %s231_s17 = scalar_lea.sflag (!%p1148_p8), [#allocation3], %s1277_s14 }
  0x61   : > { %s234_s23 = scalar_lea.vmem (!%p1148_p8), [#allocation2], %s736_s15  ;;  %p1383_p4 = scmp.ne.s32.totalorder (!%p1148_p8), %s1376_s24, 0 }
  0x66   : > { %1040 = dma.done.wait (%p1383_p4), %s231_s17, 64  }
  0x67   : > { %1042 = vsyncadd (%p1383_p4), %s231_s17, 4294967232  ;;  %p1384_p7 = scmp.eq.s32.totalorder %s1129_s22, 0 }
  0x69   : > { %1044 = dma.done.wait (%p1384_p7), [#allocation6], 1792   ;;  %p1385_p11 = pmov %p1384_p7 }
  0x6a   : > { %v1074_v0 = vmov 0   ;;  %v1075_v1 = vmov 0.0   ;;  %v889_v2 = vld [vmem:[#allocation5 + $0x4] ss:$12 sps:$4 sm:$0xff]   ;;  %v891_v3 = vld [vmem:[#allocation5] ss:$12 sps:$4 sm:$0xff]   ;;  %v280_v9 = vlaneseq }
  0x6b   : > { %1046 = vsyncadd (%p1385_p11), [#allocation6], 4294965504  ;;  %363 = vmatprep.mubr.bf16.mxu1 %v1074_v0  ;;  %795 = vmatprep.subr.bf16.mxu0 %v1075_v1  ;;  %v892_v4 = vld [vmem:[#allocation5 + $0x1c] ss:$12 sps:$4 sm:$0xff]   ;;  %v894_v5 = vld [vmem:[#allocation5 + $0x18] ss:$12 sps:$4 sm:$0xff]  }
  0x6c   : > { %331 = vmatprep.subr.bf16.mxu1 %v889_v2  ;;  %vm327_vm0 = vcmask 261120   ;;  %v269_v6 = vld [vmem:[%s234_s23] sm:$0xf]  ;;  %v895_v7 = vld [vmem:[#allocation5 + $0x8] ss:$12 sps:$4 sm:$0xff]   ;;  %vm1076_vm1 = vmmov 0  }
  0x6d   : > { %332 = vmatpush1.bf16.msra.mxu1 %v891_v3  ;;  %v896_v8 = vld [vmem:[#allocation5 + $0x20] ss:$12 sps:$4 sm:$0xff]   ;;  %811 = vmatprep.mubr.msk.bf16.mxu0 %vm1076_vm1, %v1075_v1  ;;  %v281_v10 = vshrl.u32 %v280_v9, 7  ;;  %v278_v12 = vld [vmem:[%s1369_s2] sm:$0x7]  ;;  %vm471_vm2 = vcmask 1043456  }
  0x6e   : > { %333 = vmatprep.subr.bf16.mxu1 %v892_v4  ;;  %vm455_vm3 = vcmask 64512   ;;  %v897_v43 = vld [vmem:[#allocation7] sm:$0xff]   ;;  %v898_v44 = vld [vmem:[#allocation7 + $0x8] sm:$0xff]   ;;  %v899_v45 = vld [vmem:[#allocation7 + $0x10] sm:$0xff]   ;;  %s756_s12 = sshll.u32 %s1129_s22, 4  ;;  %s267_s13 = scalar_lea.vmem [#allocation8], %s1277_s14 }
  0x6f   : > { %v286_v11 = vsub.s32 1, %v281_v10  ;;  %v282_v14 = vsub.s32 0, %v281_v10  ;;  %v290_v24 = vsub.s32 2, %v281_v10  ;;  %796 = vmatpush3.bf16.msra.mxu0 %v897_v43  ;;  %v900_v46 = vld [vmem:[#allocation7 + $0x18] sm:$0xff]   ;;  %v901_v51 = vld [vmem:[#allocation7 + $0x20] sm:$0xff]   ;;  %v902_v52 = vld [vmem:[#allocation7 + $0x28] sm:$0xff]   ;;  %s1323_s8 = scalar_lea.hbm %s1372_s5, %s756_s12 }
  0x70   : > { %797 = vmatprep.subr.bf16.mxu0 %v1075_v1  ;;  %v903_v53 = vld [vmem:[#allocation7 + $0x30] sm:$0xff]   ;;  %v904_v54 = vld [vmem:[#allocation7 + $0x38] sm:$0xff]   ;;  %s643_s7 = sshll.u32 %s267_s13, 4  ;;  %s631_s9 = scalar_lea.sflag [#allocation4], %s1277_s14  ;;  %s1325_s7 = int_to_ptr.vmem [resolvable:$true] %s643_s7 }
  0x71   : > { %334 = vmatpush1.bf16.msra.mxu1 %v894_v5  ;;  %v287_v13 = vrot.slane %v278_v12, %v286_v11  ;;  %v283_v19 = vrot.slane %v278_v12, %v282_v14  ;;  %v291_v25 = vrot.slane %v278_v12, %v290_v24  ;;  %s995_s22 = scalar_lea.vmem %s1325_s7, 16  ;;  %p1386_p0 = scmp.ne.s32.totalorder %s1381_s30, 0 }
  0x72   : > { %775 = vmatprep.subr.bf16.mxu1 %v1075_v1  ;;  %p996_p8 = scmp.ne.s32.totalorder %s1325_s7, %s995_s22  ;;  %s1077_s11 = smov [#allocation8]  }
  0x73   : > { %798 = vmatpush3.bf16.msra.mxu0 %v898_v44  ;;  %s999_s15 = sshll.u32 %s1077_s11, 4  ;;  %s1000_s15 = int_to_ptr.vmem [resolvable:$false] %s999_s15 }
  0x74   : > { %745 = vmatmul.mubr.msk.bf16.vlgmr.msra.gmra.mrb[0].mxu1 %vm327_vm0, %v269_v6  ;;  %799 = vmatprep.subr.bf16.mxu0 %v1075_v1  ;;  %p997_p1 = pnand %p996_p8, %p1386_p0  ;;  %s1001_s17 = scalar_lea.vmem %s1000_s15, 32 }
  0x75   : > { %776 = vmatpush3.bf16.msra.mxu1 %v895_v7  ;;  %779 = vmatprep.mubr.msk.bf16.mxu1 %vm1076_vm1, %v1075_v1  ;;  %p1002_p5 = scmp.lt.s32.totalorder %s1325_s7, %s1000_s15  ;;  %p1003_p9 = scmp.lt.s32.totalorder %s1001_s17, %s995_s22 }
  0x76   : > { %777 = vmatprep.subr.bf16.mxu1 %v1075_v1  ;;  %p998_p3 = pneg %p997_p1 }
  0x77   : > { %800 = vmatpush3.bf16.msra.mxu0 %v899_v45  ;;  %p1004_p12 = por %p1003_p9, %p1002_p5 }
  0x78   : > { %801 = vmatprep.subr.bf16.mxu0 %v1075_v1 }
  0x79   : > { %778 = vmatpush3.bf16.msra.mxu1 %v896_v8  ;;  %p1005_p2 = pnand %p1004_p12, %p998_p3 }
  0x7a   : > { %783 = vmatprep.subr.bf16.mxu1 %v1075_v1 }
  0x7b   : > { %802 = vmatpush3.bf16.msra.mxu0 %v900_v46 }
  0x7c   : > { %780 = vmatmul.mubr.msk.bf16.vlgmr.msra.gmra.mrb[4].mxu1 %vm327_vm0, %v269_v6  ;;  %803 = vmatprep.subr.bf16.mxu0 %v1075_v1 }
  0x7d   : > { %785 = vmatprep.mubr.msk.bf16.mxu1 %vm1076_vm1, %v1075_v1 }
  0x7f   : > { %804 = vmatpush3.bf16.msra.mxu0 %v901_v51 }
  0x80   : > { %805 = vmatprep.subr.bf16.mxu0 %v1075_v1 }
  0x83   : > { %806 = vmatpush3.bf16.msra.mxu0 %v902_v52 }
  0x84   : > { %807 = vmatprep.subr.bf16.mxu0 %v1075_v1 }
  0x87   : > { %808 = vmatpush3.bf16.msra.mxu0 %v903_v53 }
  0x88   : > { %809 = vmatprep.subr.bf16.mxu0 %v1075_v1 }
  0x8b   : > { %810 = vmatpush3.bf16.msra.mxu0 %v904_v54 }
 0x147   : > { %v365_v15 = vpop.f32.mrb[0].mxu1 }
 0x148   : > { %v367_v16 = vpop.f32.mrb[1].mxu1  ;;  %v366_v22 = vadd.f32 %v365_v15, %v283_v19 }
 0x149   : > { %v368_v17 = vadd.f32 %v367_v16, %v287_v13  ;;  %v369_v18 = vpop.f32.mrb[2].mxu1 }
 0x14a   : > { %v370_v20 = vpop.f32.mrb[3].mxu1  ;;  %v412_v23 = vpack.c.bf16 %v366_v22, %v366_v22 }
 0x14b   : > { %v413_v21 = vpack.c.bf16 %v368_v17, %v368_v17 }
 0x14d   : > { %784 = vmatpush3.bf16.xpose.msra.mxu1 %v413_v21 }
 0x14e   : > { %789 = vmatprep.subr.bf16.mxu1 %v1075_v1 }
 0x14f   : > { %v406_v26 = vpop.f32.mrb[4].mxu1 }
 0x150   : > { %v407_v27 = vadd.f32 %v406_v26, %v291_v25  ;;  %v781_v28 = vpop.f32.mrb[5].mxu1 }
 0x151   : > { %v409_v29 = vpop.f32.mrb[6].mxu1 }
 0x152   : > { %v414_v30 = vpack.c.bf16 %v407_v27, %v407_v27  ;;  %v782_v31 = vpop.f32.mrb[7].mxu1 }
 0x154   : > { %786 = vmatmul.mubr.bf16.vlgmr.msra.gmra.mrb[8].mxu1 %v412_v23  ;;  %v473_v32 = vsel %vm471_vm2, %v414_v30, 0 }
 0x155   : > { %791 = vmatprep.mubr.msk.bf16.mxu1 %vm1076_vm1, %v1075_v1  ;;  %790 = vmatpush3.bf16.msra.mxu1 %v473_v32  ;;  %v540_v1 = vld [vmem:[%s1371_s4] sm:$0x1] }
 0x227   : > { %v449_v33 = vpop.f32.mrb[8].mxu1 }
 0x228   : > { %v787_v34 = vpop.f32.mrb[9].mxu1  ;;  %v456_v35 = vsel %vm455_vm3, %v449_v33, -inf }
 0x229   : > { %457 = vmax.xlane.f32.xlu0 %v456_v35  ;;  %v452_v36 = vpop.f32.mrb[10].mxu1 }
 0x22a   : > { %v788_v37 = vpop.f32.mrb[11].mxu1 }
 0x2b6   : > { %v458_v38 = vpop.xlane.xlu0 %457 }
 0x2b7   : > { %v459_v39 = vsub.f32 %v449_v33, %v458_v38 }
 0x2b9   : > { %v460_v40 = vmul.f32 1.442695, %v459_v39 }
 0x2bb   : > { %905 = vpow2.f32 %v460_v40 }
 0x2c5   : > { %v906_v41 = vpop.eup %905 }
 0x2c6   : > { %v462_v42 = vsel %vm455_vm3, %v906_v41, 0.0 }
 0x2c7   : > { %463 = vadd.xlane.f32.xlu0 %v462_v42 }
 0x354   : > { %v464_v47 = vpop.xlane.xlu0 %463 }
 0x355   : > { %907 = vrcp.f32 %v464_v47 }
 0x35f   : > { %v908_v48 = vpop.eup %907 }
 0x360   : > { %v466_v49 = vmul.f32 %v908_v48, %v906_v41 }
 0x362   : > { %v467_v50 = vpack.c.bf16 %v466_v49, %v466_v49 }
 0x364   : > { %792 = vmatmul.mubr.msk.bf16.vlgmr.msra.gmra.mrb[12].mxu1 %vm455_vm3, %v467_v50 }
 0x437   : > { %v509_v55 = vpop.f32.mrb[12].mxu1 }
 0x438   : > { %v515_v56 = vrot.slane %v509_v55, 4  ;;  %v793_v57 = vpop.f32.mrb[13].mxu1 }
 0x439   : > { %v512_v58 = vpop.f32.mrb[14].mxu1 }
 0x43a   : > { %v516_v59 = vadd.f32 %v515_v56, %v509_v55  ;;  %v794_v60 = vpop.f32.mrb[15].mxu1 }
 0x43c   : > { %v517_v61 = vrot.slane %v516_v59, 2 }
 0x43e   : > { %v518_v62 = vadd.f32 %v517_v61, %v516_v59 }
 0x440   : > { %v519_v63 = vrot.slane %v518_v62, 1 }
 0x442   : > { %v520_v0 = vadd.f32 %v519_v63, %v518_v62 }
 0x444   : > { %v522_v2 = vmul.f32 0.125, %v520_v0 }
 0x446   : > { %v523_v3 = vpack.c.bf16 %v522_v2, %v522_v2 }
 0x448   : > { %812 = vmatmul.mubr.bf16.vlgmr.msra.gmra.mrb[0].mxu0 %v523_v3 }
 0x51b   : > { %v623_v4 = vpop.f32.mrb[0].mxu0 }
 0x51c   : > { %v624_v5 = vadd.f32 %v623_v4, %v540_v1  ;;  %v813_v6 = vpop.f32.mrb[1].mxu0 }
 0x51d   : > { %v626_v7 = vpop.f32.mrb[2].mxu0 }
 0x51e   : > { %629 = vst [vmem:[%s267_s13] sm:$0x1] %v624_v5  ;;  %v814_v8 = vpop.f32.mrb[3].mxu0 }
 0x51f   : > { %1008 = shalt.err (!%p1005_p2)
}
 0x520   : > { %s1009_s14 = scalar_lea.hbm %s1323_s8, 16  ;;  %s1013_s26 = scalar_lea.hbm %s1372_s5, 32 }
 0x521   : > { %p1010_p13 = scmp.ne.s32.totalorder %s1323_s8, %s1009_s14  ;;  %p1014_p4 = scmp.lt.u32.totalorder %s1323_s8, %s1372_s5 }
 0x522   : > { %p1015_p7 = scmp.lt.u32.totalorder %s1013_s26, %s1009_s14  ;;  %p1017_p8 = scmp.lt.u32.totalorder %s1009_s14, %s1323_s8 }
 0x523   : > { %p1011_p6 = pnand %p1010_p13, %p1386_p0 }
 0x524   : > { %p1016_p11 = por %p1015_p7, %p1014_p4 }
 0x525   : > { %p1012_p10 = pneg %p1011_p6 }
 0x526   : > { %p1018_p1 = por %p1017_p8, %p1016_p11 }
 0x528   : > { %p1019_p3 = pnand %p1018_p1, %p1012_p10 }
 0x52a   : > { %1022 = shalt.err (!%p1019_p3)
}
 0x52b   : > { %825 = dma.vmem_to_hbm [thread:$0]  (%p1386_p0), %s1325_s7, 16, %s1323_s8, %s631_s9  }
 0x52c PF: > { %s655_s12 = sand.u32 1, %s1053_s18   ;;  %p1387_p5 = scmp.ne.s32.totalorder %s1377_s25, 0 }
 0x52d   : > { %p1388_p9 = scmp.ge.s32.totalorder %s1065_s21, 2  ;;  %s656_s13 = scalar_lea.sflag [#allocation4], %s655_s12 }
 0x52f   : > { %p839_p12 = pnand %p1388_p9, %p1387_p5 }
 0x531   : > { %1048 = dma.done.wait (!%p839_p12), %s656_s13, 16  }
 0x532   : > { %1050 = vsyncadd (!%p839_p12), %s656_s13, 4294967280  ;;  %p19_p2 = scmp.ge.s32.totalorder %s1218_s16, 4   ;;  %s1389_s18 = smov %s1057_s19 }
 0x533   : > { %s1390_s19 = smov %s1061_s20  ;;  %s1391_s20 = smov %s1227_s27 }
 0x534   : > { %s1392_s21 = smov %s1218_s16  ;;  %21 = sbr.rel (!%p19_p2) target bundleno = 6 (0x6), region = 93 }
 0x53b   :  { %660 = vsyncpa [#allocation3], 1 }
 0x53c   :  { %662 = vsyncpa [#allocation3 + $0x1], 1 }
 0x53d   :  { %663 = vsyncpa [#allocation6], 1 }
 0x53e   :  { %664 = vsyncpa [#allocation4], 1 }
 0x53f   :  { %666 = vsyncpa [#allocation4 + $0x1], 1 }

</bundles_post_ra>
